<compile_context>
chip_gen: v5e
topology: v5e:2x2
jax: 0.10.0
libtpu: 0.0.40
codegen_flags: <defaults>
</compile_context>

<pallas_src>
import functools

import jax
import jax.numpy as jnp
import numpy as np
from jax.experimental import pallas as pl
from jax.experimental.pallas import tpu as pltpu

# ----------------------------- problem sizes -------------------------------
SEGMENTS = (6, 10)       # `a`: per-segment lengths along dim 0 (sum = rows)
ROWS = sum(SEGMENTS)     # 16
FEATS = 128              # per-row feature width (lane-dense)
SCALE = 1.0              # initial value of the trainable scale parameter


def _step_kernel(scale_ref, x_ref, t_ref, c_ref, out_ref, *, kmax):
    """out = 1 + sum_k c[:, k] * sigmoid(scale * (x - t[:, k])).

    Uses sigmoid(z) = 0.5 * tanh(z / 2) + 0.5 so each term costs a single EUP
    op (tanh) plus a handful of VPU ops.  Zero-padded coefficients make the
    padded terms contribute exactly nothing.
    """
    half_scale = 0.5 * scale_ref[0, 0]          # scalar parameter from SMEM
    sx = half_scale * x_ref[...]                # [RB, F]  (hoisted out of loop)
    st = half_scale * t_ref[...]                # [RB, K]
    hc = 0.5 * c_ref[...]                       # [RB, K]

    # Constant part folded out of the sigmoid: 1 + sum_k 0.5 * c_k.
    base = 1.0 + jnp.sum(hc, axis=1, keepdims=True)        # [RB, 1]
    acc = jnp.broadcast_to(base, sx.shape)                  # [RB, F]

    # K is small and static -> fully unrolled elementwise loop; only VPU + EUP.
    for k in range(kmax):
        acc = acc + hc[:, k:k + 1] * jnp.tanh(sx - st[:, k:k + 1])
    out_ref[...] = acc


def _build_row_tables(segments, dtype=np.float32):
    """Expand per-segment thresholds/coefficients into zero-padded per-row tables."""
    kmax = max(max(int(n) for n in segments) - 1, 1)
    rows = int(sum(int(n) for n in segments))
    thr = np.zeros((rows, kmax), dtype)
    coef = np.zeros((rows, kmax), dtype)   # zero-padded terms contribute nothing
    start = 0
    for n in segments:
        n = int(n)
        if n > 1:
            k = np.arange(1, n, dtype=dtype)
            thr[start:start + n, :n - 1] = (n + 1) - 2.0 * k
            coef[start:start + n, :n - 1] = np.arange(n - 1, 0, -1, dtype=dtype)
        start += n
    return jnp.asarray(thr), jnp.asarray(coef), kmax


def _choose_row_block(rows):
    """Single grid step for small problems; otherwise largest 8-aligned divisor."""
    if rows <= 256:
        return rows
    for rb in (256, 128, 64, 32, 16, 8):
        if rows % rb == 0:
            return rb
    return rows


def step_function_forward(x, segments, scale):
    rows, feats = x.shape
    thr, coef, kmax = _build_row_tables(segments)
    scale_arr = jnp.asarray(scale, jnp.float32).reshape(1, 1)

    row_block = _choose_row_block(rows)
    grid = (rows // row_block,)

    kernel = functools.partial(_step_kernel, kmax=kmax)
    return pl.pallas_call(
        kernel,
        out_shape=jax.ShapeDtypeStruct((rows, feats), jnp.float32),
        grid=grid,
        in_specs=[
            pl.BlockSpec(memory_space=pltpu.MemorySpace.SMEM),     # scale (1,1)
            pl.BlockSpec((row_block, feats), lambda i: (i, 0)),    # x
            pl.BlockSpec((row_block, kmax), lambda i: (i, 0)),     # thresholds
            pl.BlockSpec((row_block, kmax), lambda i: (i, 0)),     # coefficients
        ],
        out_specs=pl.BlockSpec((row_block, feats), lambda i: (i, 0)),
        compiler_params=pltpu.CompilerParams(
            dimension_semantics=("parallel",)),
    )(scale_arr, x, thr, coef)


def _reference_forward(x, segments, scale):
    """Pure-JAX mirror of the PyTorch module, for the correctness check."""
    outs = []
    start = 0
    for n in segments:
        n = int(n)
        seg = x[start:start + n]
        if n > 1:
            thr = (n + 1) - 2.0 * jnp.arange(1, n, dtype=x.dtype)
            coef = jnp.arange(n - 1, 0, -1, dtype=x.dtype)
            s = jax.nn.sigmoid(scale * (seg[..., None] - thr))
            outs.append(1.0 + jnp.sum(coef * s, axis=-1))
        else:
            outs.append(jnp.ones_like(seg))
        start += n
    return jnp.concatenate(outs, axis=0)


if __name__ == "__main__":
    key = jax.random.PRNGKey(0)
    # spread values across the threshold range (roughly [-(N-3), N-1])
    x = 5.0 * jax.random.normal(key, (ROWS, FEATS), jnp.float32)

    out = step_function_forward(x, SEGMENTS, SCALE)
    out = jax.block_until_ready(out)

    ref = _reference_forward(x, SEGMENTS, jnp.float32(SCALE))
    assert out.shape == (ROWS, FEATS)
    # tanh-based sigmoid is exact (no approx reciprocal) -> tight tolerance
    assert jnp.allclose(out, ref, rtol=1e-3, atol=1e-3), (
        float(jnp.max(jnp.abs(out - ref))))
    print("KERNEL_OK")
</pallas_src>

<mosaic_0001>
module attributes {stable_mosaic.version = 11 : i64} {
  func.func @_step_kernel(%arg0: i32, %arg1: memref<1x1xf32, #tpu.memory_space<smem>>, %arg2: memref<16x128xf32, #tpu.memory_space<vmem>>, %arg3: memref<16x9xf32, #tpu.memory_space<vmem>>, %arg4: memref<16x9xf32, #tpu.memory_space<vmem>>, %arg5: memref<16x128xf32, #tpu.memory_space<vmem>>) attributes {dimension_semantics = [#tpu.dimension_semantics<parallel>], iteration_bounds = array<i64: 1>, scalar_prefetch = 0 : i64, scratch_operands = 0 : i64, tpu.core_type = #tpu.core_type<tc>, window_params = [{transform_indices = @transform_0, window_bounds = array<i64: 1, 1>}, {transform_indices = @transform_1, window_bounds = array<i64: 16, 128>}, {transform_indices = @transform_2, window_bounds = array<i64: 16, 9>}, {transform_indices = @transform_3, window_bounds = array<i64: 16, 9>}, {transform_indices = @transform_4, window_bounds = array<i64: 16, 128>}]} {
    %c0 = arith.constant 0 : index
    %c0_0 = arith.constant 0 : index
    %0 = memref.load %arg1[%c0, %c0_0] : memref<1x1xf32, #tpu.memory_space<smem>>
    %cst = arith.constant 5.000000e-01 : f32
    %1 = arith.mulf %cst, %0 : f32
    %c0_1 = arith.constant 0 : index
    %c0_2 = arith.constant 0 : index
    %2 = vector.load %arg2[%c0_1, %c0_2] : memref<16x128xf32, #tpu.memory_space<vmem>>, vector<16x128xf32>
    %3 = vector.broadcast %1 : f32 to vector<16x128xf32>
    %4 = arith.mulf %3, %2 : vector<16x128xf32>
    %c0_3 = arith.constant 0 : index
    %c0_4 = arith.constant 0 : index
    %5 = vector.load %arg3[%c0_3, %c0_4] : memref<16x9xf32, #tpu.memory_space<vmem>>, vector<16x9xf32>
    %6 = vector.broadcast %1 : f32 to vector<16x9xf32>
    %7 = arith.mulf %6, %5 : vector<16x9xf32>
    %c0_5 = arith.constant 0 : index
    %c0_6 = arith.constant 0 : index
    %8 = vector.load %arg4[%c0_5, %c0_6] : memref<16x9xf32, #tpu.memory_space<vmem>>, vector<16x9xf32>
    %cst_7 = arith.constant 5.000000e-01 : f32
    %9 = vector.broadcast %cst_7 : f32 to vector<16x9xf32>
    %10 = arith.mulf %9, %8 : vector<16x9xf32>
    %cst_8 = arith.constant dense<0.000000e+00> : vector<16xf32>
    %11 = vector.multi_reduction <add>, %10, %cst_8 [1] : vector<16x9xf32> to vector<16xf32>
    %12 = vector.shape_cast %11 : vector<16xf32> to vector<16x1xf32>
    %cst_9 = arith.constant 1.000000e+00 : f32
    %13 = vector.broadcast %cst_9 : f32 to vector<16x1xf32>
    %14 = arith.addf %13, %12 : vector<16x1xf32>
    %15 = vector.shape_cast %14 : vector<16x1xf32> to vector<16x1xf32>
    %16 = vector.broadcast %15 : vector<16x1xf32> to vector<16x128xf32>
    %17 = vector.extract_strided_slice %10 {offsets = [0, 0], sizes = [16, 1], strides = [1, 1]} : vector<16x9xf32> to vector<16x1xf32>
    %18 = vector.extract_strided_slice %7 {offsets = [0, 0], sizes = [16, 1], strides = [1, 1]} : vector<16x9xf32> to vector<16x1xf32>
    %19 = vector.broadcast %18 : vector<16x1xf32> to vector<16x128xf32>
    %20 = arith.subf %4, %19 : vector<16x128xf32>
    %21 = math.tanh %20 : vector<16x128xf32>
    %22 = vector.broadcast %17 : vector<16x1xf32> to vector<16x128xf32>
    %23 = arith.mulf %22, %21 : vector<16x128xf32>
    %24 = arith.addf %16, %23 : vector<16x128xf32>
    %25 = vector.extract_strided_slice %10 {offsets = [0, 1], sizes = [16, 1], strides = [1, 1]} : vector<16x9xf32> to vector<16x1xf32>
    %26 = vector.extract_strided_slice %7 {offsets = [0, 1], sizes = [16, 1], strides = [1, 1]} : vector<16x9xf32> to vector<16x1xf32>
    %27 = vector.broadcast %26 : vector<16x1xf32> to vector<16x128xf32>
    %28 = arith.subf %4, %27 : vector<16x128xf32>
    %29 = math.tanh %28 : vector<16x128xf32>
    %30 = vector.broadcast %25 : vector<16x1xf32> to vector<16x128xf32>
    %31 = arith.mulf %30, %29 : vector<16x128xf32>
    %32 = arith.addf %24, %31 : vector<16x128xf32>
    %33 = vector.extract_strided_slice %10 {offsets = [0, 2], sizes = [16, 1], strides = [1, 1]} : vector<16x9xf32> to vector<16x1xf32>
    %34 = vector.extract_strided_slice %7 {offsets = [0, 2], sizes = [16, 1], strides = [1, 1]} : vector<16x9xf32> to vector<16x1xf32>
    %35 = vector.broadcast %34 : vector<16x1xf32> to vector<16x128xf32>
    %36 = arith.subf %4, %35 : vector<16x128xf32>
    %37 = math.tanh %36 : vector<16x128xf32>
    %38 = vector.broadcast %33 : vector<16x1xf32> to vector<16x128xf32>
    %39 = arith.mulf %38, %37 : vector<16x128xf32>
    %40 = arith.addf %32, %39 : vector<16x128xf32>
    %41 = vector.extract_strided_slice %10 {offsets = [0, 3], sizes = [16, 1], strides = [1, 1]} : vector<16x9xf32> to vector<16x1xf32>
    %42 = vector.extract_strided_slice %7 {offsets = [0, 3], sizes = [16, 1], strides = [1, 1]} : vector<16x9xf32> to vector<16x1xf32>
    %43 = vector.broadcast %42 : vector<16x1xf32> to vector<16x128xf32>
    %44 = arith.subf %4, %43 : vector<16x128xf32>
    %45 = math.tanh %44 : vector<16x128xf32>
    %46 = vector.broadcast %41 : vector<16x1xf32> to vector<16x128xf32>
    %47 = arith.mulf %46, %45 : vector<16x128xf32>
    %48 = arith.addf %40, %47 : vector<16x128xf32>
    %49 = vector.extract_strided_slice %10 {offsets = [0, 4], sizes = [16, 1], strides = [1, 1]} : vector<16x9xf32> to vector<16x1xf32>
    %50 = vector.extract_strided_slice %7 {offsets = [0, 4], sizes = [16, 1], strides = [1, 1]} : vector<16x9xf32> to vector<16x1xf32>
    %51 = vector.broadcast %50 : vector<16x1xf32> to vector<16x128xf32>
    %52 = arith.subf %4, %51 : vector<16x128xf32>
    %53 = math.tanh %52 : vector<16x128xf32>
    %54 = vector.broadcast %49 : vector<16x1xf32> to vector<16x128xf32>
    %55 = arith.mulf %54, %53 : vector<16x128xf32>
    %56 = arith.addf %48, %55 : vector<16x128xf32>
    %57 = vector.extract_strided_slice %10 {offsets = [0, 5], sizes = [16, 1], strides = [1, 1]} : vector<16x9xf32> to vector<16x1xf32>
    %58 = vector.extract_strided_slice %7 {offsets = [0, 5], sizes = [16, 1], strides = [1, 1]} : vector<16x9xf32> to vector<16x1xf32>
    %59 = vector.broadcast %58 : vector<16x1xf32> to vector<16x128xf32>
    %60 = arith.subf %4, %59 : vector<16x128xf32>
    %61 = math.tanh %60 : vector<16x128xf32>
    %62 = vector.broadcast %57 : vector<16x1xf32> to vector<16x128xf32>
    %63 = arith.mulf %62, %61 : vector<16x128xf32>
    %64 = arith.addf %56, %63 : vector<16x128xf32>
    %65 = vector.extract_strided_slice %10 {offsets = [0, 6], sizes = [16, 1], strides = [1, 1]} : vector<16x9xf32> to vector<16x1xf32>
    %66 = vector.extract_strided_slice %7 {offsets = [0, 6], sizes = [16, 1], strides = [1, 1]} : vector<16x9xf32> to vector<16x1xf32>
    %67 = vector.broadcast %66 : vector<16x1xf32> to vector<16x128xf32>
    %68 = arith.subf %4, %67 : vector<16x128xf32>
    %69 = math.tanh %68 : vector<16x128xf32>
    %70 = vector.broadcast %65 : vector<16x1xf32> to vector<16x128xf32>
    %71 = arith.mulf %70, %69 : vector<16x128xf32>
    %72 = arith.addf %64, %71 : vector<16x128xf32>
    %73 = vector.extract_strided_slice %10 {offsets = [0, 7], sizes = [16, 1], strides = [1, 1]} : vector<16x9xf32> to vector<16x1xf32>
    %74 = vector.extract_strided_slice %7 {offsets = [0, 7], sizes = [16, 1], strides = [1, 1]} : vector<16x9xf32> to vector<16x1xf32>
    %75 = vector.broadcast %74 : vector<16x1xf32> to vector<16x128xf32>
    %76 = arith.subf %4, %75 : vector<16x128xf32>
    %77 = math.tanh %76 : vector<16x128xf32>
    %78 = vector.broadcast %73 : vector<16x1xf32> to vector<16x128xf32>
    %79 = arith.mulf %78, %77 : vector<16x128xf32>
    %80 = arith.addf %72, %79 : vector<16x128xf32>
    %81 = vector.extract_strided_slice %10 {offsets = [0, 8], sizes = [16, 1], strides = [1, 1]} : vector<16x9xf32> to vector<16x1xf32>
    %82 = vector.extract_strided_slice %7 {offsets = [0, 8], sizes = [16, 1], strides = [1, 1]} : vector<16x9xf32> to vector<16x1xf32>
    %83 = vector.broadcast %82 : vector<16x1xf32> to vector<16x128xf32>
    %84 = arith.subf %4, %83 : vector<16x128xf32>
    %85 = math.tanh %84 : vector<16x128xf32>
    %86 = vector.broadcast %81 : vector<16x1xf32> to vector<16x128xf32>
    %87 = arith.mulf %86, %85 : vector<16x128xf32>
    %88 = arith.addf %80, %87 : vector<16x128xf32>
    %c0_10 = arith.constant 0 : index
    %c0_11 = arith.constant 0 : index
    %89 = vector.load %arg5[%c0_10, %c0_11] : memref<16x128xf32, #tpu.memory_space<vmem>>, vector<16x128xf32>
    tpu.vector_store %arg5[%c0_10, %c0_11], %88 {strides = array<i32>} : memref<16x128xf32, #tpu.memory_space<vmem>>, vector<16x128xf32>,
    return
  }
  func.func @transform_0(%arg0: i32) -> (i32, i32) {
    %c0_i32 = arith.constant 0 : i32
    %c0_i32_0 = arith.constant 0 : i32
    %c0_i32_1 = arith.constant 0 : i32
    return %c0_i32, %c0_i32_0 : i32, i32
  }
  func.func @transform_1(%arg0: i32) -> (i32, i32) {
    %c0_i32 = arith.constant 0 : i32
    %c0_i32_0 = arith.constant 0 : i32
    return %arg0, %c0_i32 : i32, i32
  }
  func.func @transform_2(%arg0: i32) -> (i32, i32) {
    %c0_i32 = arith.constant 0 : i32
    %c0_i32_0 = arith.constant 0 : i32
    return %arg0, %c0_i32 : i32, i32
  }
  func.func @transform_3(%arg0: i32) -> (i32, i32) {
    %c0_i32 = arith.constant 0 : i32
    %c0_i32_0 = arith.constant 0 : i32
    return %arg0, %c0_i32 : i32, i32
  }
  func.func @transform_4(%arg0: i32) -> (i32, i32) {
    %c0_i32 = arith.constant 0 : i32
    %c0_i32_0 = arith.constant 0 : i32
    return %arg0, %c0_i32 : i32, i32
  }
}

</mosaic_0001>

<bundles_post_ra>
// kernel: tpu_custom_call.1
= control target key start
LH: loop header
LB: loop body
LE: loop exit
PB: predicated region body
PF: predicated region fallthrough
CT: control target
= control target key end

     0   :  { %10 = vsyncpa [#allocation4], 0  ;;  %s641_s0 = inlined_call_operand.<no memory space> [shape: f32[1,1], index: 0, kind: input, shape index: {}]   ;;  %s642_s1 = inlined_call_operand.hbm [shape: f32[16,128], index: 1, kind: input, shape index: {}]   ;;  %s643_s2 = inlined_call_operand.hbm [shape: f32[16,9], index: 2, kind: input, shape index: {}]   ;;  %s644_s3 = inlined_call_operand.hbm [shape: f32[16,9], index: 3, kind: input, shape index: {}]   ;;  %s645_s4 = inlined_call_operand.hbm [shape: f32[16,128], index: 4, kind: output, shape index: {}]  }
   0x1   :  { %11 = vsyncpa [#allocation7], 0 }
   0x2   :  { %12 = vsyncpa [#allocation5], 0  ;;  %s32_s17 = sshll.u32 %s643_s2, 4  ;;  %s511_s18 = smov [#allocation6]   ;;  %s33_s17 = int_to_ptr.hbm [resolvable:$true] %s32_s17 }
   0x3   :  { %s34_s19 = sshll.u32 %s511_s18, 4  ;;  %s19_s22 = sshll.u32 %s642_s1, 4  ;;  %s35_s19 = int_to_ptr.vmem [resolvable:$true] %s34_s19  ;;  %s20_s22 = int_to_ptr.hbm [resolvable:$true] %s19_s22 }
   0x4   :  { %s512_s23 = smov 128   ;;  %s513_s24 = smov 8  }
   0x5   :  { %40 = dma.hbm_to_vmem [thread:$0]  %s33_s17, 256, %s35_s19, [#allocation7], %s512_s23, %s512_s23, %s513_s24  }
   0x6   :  { %s514_s25 = smov [#allocation3]   ;;  %s45_s2 = sshll.u32 %s644_s3, 4  ;;  %s46_s2 = int_to_ptr.hbm [resolvable:$true] %s45_s2 }
   0x7   :  { %s21_s26 = sshll.u32 %s514_s25, 4  ;;  %s515_s1 = smov [#allocation8]   ;;  %s22_s26 = int_to_ptr.vmem [resolvable:$true] %s21_s26 }
   0x8   :  { %27 = dma.hbm_to_vmem [thread:$0]  %s20_s22, 256, %s22_s26, [#allocation4], %s512_s23, %s512_s23, %s513_s24  }
   0x9   :  { %s47_s29 = sshll.u32 %s515_s1, 4  ;;  %s48_s29 = int_to_ptr.vmem [resolvable:$true] %s47_s29 }
   0xa   :  { %53 = dma.hbm_to_vmem [thread:$0]  %s46_s2, 256, %s48_s29, [#allocation7], %s512_s23, %s512_s23, %s513_s24  }
   0xb   :  { %505 = dma.done.wait [#allocation4], 256  }
   0xc   :  { %506 = vsyncadd [#allocation4], 4294967040 }
   0xd   :  { %507 = dma.done.wait [#allocation7], 512  }
   0xe   :  { %508 = vsyncadd [#allocation7], 4294966784  ;;  %v516_v0 = vmov 0   ;;  %s67_s5 = smul.f32 0.5, %s641_s0  ;;  %v517_v1 = vmov 1   ;;  %v77_v3 = vld [vmem:[#allocation8] sm:$0xff] }
   0xf   :  { %348 = vset.pattern.permute.xlu2 %v516_v0  ;;  %347 = vset.pattern.permute.xlu1 %v516_v0  ;;  %v73_v4 = vld [vmem:[#allocation6] sm:$0xff]  ;;  %vm81_vm0 = vcmask 72704   ;;  %v574_v5 = vmul.f32 0.5, %v77_v3  ;;  %v78_v7 = vld [vmem:[#allocation8 + $0x8] sm:$0xff]  ;;  %v74_v9 = vld [vmem:[#allocation6 + $0x8] sm:$0xff]  ;;  %v518_v13 = vmov 2  }
  0x10   :  { %349 = vset.pattern.permute.xlu0 %v517_v1  ;;  %v572_v2 = vstv %s67_s5  ;;  %v582_v10 = vmul.f32 0.5, %v78_v7  ;;  %v519_v14 = vmov 3   ;;  %v520_v15 = vmov 5   ;;  %v68_v23 = vld [vmem:[#allocation3] sm:$0xff]  ;;  %v69_v27 = vld [vmem:[#allocation3 + $0x8] sm:$0xff]  ;;  %s525_s0 = smov [#allocation9]  }
  0x11   :  { %v577_v6 = vmul.f32 %v73_v4, %v572_v2  ;;  %106 = vperm.xlu2 %348, %v574_v5   ;;  %v82_v8 = vsel %vm81_vm0, %v574_v5, 0.0  ;;  %v76_v11 = vmul.f32 %v74_v9, %v572_v2  ;;  %v521_v16 = vmov 6   ;;  %s316_s6 = sshll.u32 %s525_s0, 4  ;;  %s318_s9 = sshll.u32 %s645_s4, 4  ;;  %s317_s6 = int_to_ptr.vmem [resolvable:$true] %s316_s6  ;;  %s319_s9 = int_to_ptr.hbm [resolvable:$true] %s318_s9 }
  0x12   :  { %83 = vadd.xlane.f32.xlu0 %v82_v8  ;;  %v85_v12 = vsel %vm81_vm0, %v582_v10, 0.0  ;;  %v522_v17 = vmov 4   ;;  %v523_v18 = vmov 8   ;;  %v524_v20 = vmov 7  }
  0x13   :  { %92 = vperm.xlu1 %347, %v577_v6   ;;  %v608_v24 = vmul.f32 %v572_v2, %v68_v23  ;;  %v615_v30 = vmul.f32 %v572_v2, %v69_v27 }
  0x19   :  { %111 = vperm.xlu2 %348, %v582_v10  }
  0x1a   :  { %86 = vadd.xlane.f32.xlu0 %v85_v12 }
  0x1b   :  { %97 = vperm.xlu1 %347, %v76_v11  }
  0x21   :  { %351 = vset.pattern.permute.xlu2 %v517_v1 }
  0x22   :  { %131 = vperm.xlu2 %351, %v574_v5  }
  0x23   :  { %350 = vset.pattern.permute.xlu1 %v517_v1 }
  0x24   :  { %123 = vperm.xlu1 %350, %v76_v11  }
  0x2a   :  { %352 = vset.pattern.permute.xlu2 %v518_v13 }
  0x2b   :  { %143 = vperm.xlu2 %352, %v577_v6  }
  0x2c   :  { %135 = vperm.xlu1 %350, %v582_v10  }
  0x2e   :  { %119 = vperm.xlu0 %349, %v577_v6  }
  0x33   :  { %155 = vperm.xlu2 %352, %v574_v5  }
  0x34   :  { %353 = vset.pattern.permute.xlu1 %v518_v13 }
  0x35   :  { %147 = vperm.xlu1 %353, %v76_v11  }
  0x36   :  { %356 = vset.pattern.permute.xlu0 %v519_v14 }
  0x37   :  { %183 = vperm.xlu0 %356, %v582_v10  }
  0x3b   :  { %354 = vset.pattern.permute.xlu2 %v519_v14 }
  0x3c   :  { %167 = vperm.xlu2 %354, %v577_v6  }
  0x3d   :  { %159 = vperm.xlu1 %353, %v582_v10  }
  0x3f   :  { %359 = vset.pattern.permute.xlu0 %v520_v15 }
  0x40   :  { %215 = vperm.xlu0 %359, %v577_v6  }
  0x44   :  { %179 = vperm.xlu2 %354, %v574_v5  }
  0x45   :  { %355 = vset.pattern.permute.xlu1 %v519_v14 }
  0x46   :  { %171 = vperm.xlu1 %355, %v76_v11  }
  0x48   :  { %363 = vset.pattern.permute.xlu0 %v521_v16 }
  0x49   :  { %243 = vperm.xlu0 %363, %v76_v11  }
  0x4c   :  { %358 = vset.pattern.permute.xlu2 %v522_v17 }
  0x4d   :  { %195 = vperm.xlu2 %358, %v76_v11  }
  0x4e   :  { %357 = vset.pattern.permute.xlu1 %v522_v17 }
  0x4f   :  { %191 = vperm.xlu1 %357, %v577_v6  }
  0x51   :  { %368 = vset.pattern.permute.xlu0 %v523_v18 }
  0x52   :  { %291 = vperm.xlu0 %368, %v76_v11  }
  0x55   :  { %207 = vperm.xlu2 %358, %v582_v10  }
  0x57   :  { %203 = vperm.xlu1 %357, %v574_v5  }
  0x5a   :  { %303 = vperm.xlu0 %368, %v582_v10  }
  0x5d   :  { %361 = vset.pattern.permute.xlu2 %v520_v15 }
  0x5e   :  { %227 = vperm.xlu2 %361, %v574_v5  }
  0x5f   :  { %360 = vset.pattern.permute.xlu1 %v520_v15 }
  0x60   :  { %219 = vperm.xlu1 %360, %v76_v11  }
  0x66   :  { %362 = vset.pattern.permute.xlu2 %v521_v16 }
  0x67   :  { %239 = vperm.xlu2 %362, %v577_v6  }
  0x68   :  { %231 = vperm.xlu1 %360, %v582_v10  }
  0x6b   :  { %v107_v19 = vpop.permute.xlu2 %106 }
  0x6f   :  { %365 = vset.pattern.permute.xlu2 %v524_v20 }
  0x70   :  { %364 = vset.pattern.permute.xlu1 %v521_v16  ;;  %263 = vperm.xlu2 %365, %v577_v6  }
  0x71   :  { %251 = vperm.xlu1 %364, %v574_v5  }
  0x73   :  { %v112_v21 = vpop.permute.xlu2 %111 }
  0x78   :  { %367 = vset.pattern.permute.xlu2 %v523_v18 }
  0x79   :  { %366 = vset.pattern.permute.xlu1 %v524_v20  ;;  %287 = vperm.xlu2 %367, %v577_v6  }
  0x7a   :  { %267 = vperm.xlu1 %366, %v76_v11  }
  0x7c   :  { %v132_v22 = vpop.permute.xlu2 %131 }
  0x81   :  { %370 = vset.pattern.permute.xlu2 %v524_v20 }
  0x82   :  { %369 = vset.pattern.permute.xlu1 %v521_v16  ;;  %275 = vperm.xlu2 %370, %v574_v5  }
  0x83   :  { %255 = vperm.xlu1 %369, %v582_v10  }
  0x85   :  { %v93_v25 = vpop.permute.xlu1 %92  ;;  %v144_v28 = vpop.permute.xlu2 %143 }
  0x86   :  { %v100_v26 = vsub.f32 %v608_v24, %v93_v25  ;;  %v150_v29 = vsub.f32 %v608_v24, %v144_v28  ;;  %v84_v34 = vpop.xlane.xlu0 %83 }
  0x87   :  { %v88_v55 = vadd.f32 1.0, %v84_v34 }
  0x88   :  { %373 = vtanh.f32 %v100_v26 }
  0x89   :  { %375 = vtanh.f32 %v150_v29 }
  0x8a   :  { %372 = vset.pattern.permute.xlu2 %v523_v18 }
  0x8b   :  { %371 = vset.pattern.permute.xlu1 %v524_v20  ;;  %299 = vperm.xlu2 %372, %v574_v5  }
  0x8c   :  { %279 = vperm.xlu1 %371, %v582_v10  }
  0x8d   :  { %v98_v31 = vpop.permute.xlu1 %97  ;;  %v156_v36 = vpop.permute.xlu2 %155 }
  0x8e   :  { %v374_v32 = vpop.eup %373  ;;  %v101_v33 = vsub.f32 %v615_v30, %v98_v31  ;;  %v87_v44 = vpop.xlane.xlu0 %86 }
  0x8f   :  { %v114_v35 = vmul.f32 %v374_v32, %v107_v19  ;;  %v376_v37 = vpop.eup %375  ;;  %v89_v45 = vadd.f32 1.0, %v87_v44 }
  0x90   :  { %377 = vtanh.f32 %v101_v33  ;;  %v162_v38 = vmul.f32 %v376_v37, %v156_v36 }
  0x91   :  { %v116_v60 = vadd.f32 %v114_v35, %v88_v55 }
  0x96   :  { %v378_v39 = vpop.eup %377  ;;  %v124_v40 = vpop.permute.xlu1 %123 }
  0x97   :  { %v115_v41 = vmul.f32 %v378_v39, %v112_v21  ;;  %v127_v42 = vsub.f32 %v615_v30, %v124_v40  ;;  %v168_v43 = vpop.permute.xlu2 %167 }
  0x98   :  { %v174_v19 = vsub.f32 %v608_v24, %v168_v43 }
  0x99   :  { %379 = vtanh.f32 %v127_v42  ;;  %v117_v48 = vadd.f32 %v115_v41, %v89_v45 }
  0x9e   :  { %v136_v46 = vpop.permute.xlu1 %135 }
  0x9f   :  { %v380_v47 = vpop.eup %379  ;;  %v180_v50 = vpop.permute.xlu2 %179 }
  0xa0   :  { %v139_v49 = vmul.f32 %v380_v47, %v136_v46  ;;  %v120_v52 = vpop.permute.xlu0 %119 }
  0xa1   :  { %v126_v53 = vsub.f32 %v608_v24, %v120_v52 }
  0xa2   :  { %v141_v51 = vadd.f32 %v139_v49, %v117_v48 }
  0xa3   :  { %381 = vtanh.f32 %v126_v53 }
  0xa7   :  { %v148_v54 = vpop.permute.xlu1 %147  ;;  %v196_v57 = vpop.permute.xlu2 %195 }
  0xa8   :  { %v151_v56 = vsub.f32 %v615_v30, %v148_v54  ;;  %v199_v58 = vsub.f32 %v615_v30, %v196_v57 }
  0xa9   :  { %v382_v59 = vpop.eup %381  ;;  %v184_v11 = vpop.permute.xlu0 %183 }
  0xaa   :  { %383 = vtanh.f32 %v151_v56  ;;  %v138_v61 = vmul.f32 %v382_v59, %v132_v22 }
  0xab   :  { %385 = vtanh.f32 %v199_v58 }
  0xac   :  { %v140_v62 = vadd.f32 %v138_v61, %v116_v60 }
  0xae   :  { %v164_v1 = vadd.f32 %v162_v38, %v140_v62 }
  0xaf   :  { %v160_v63 = vpop.permute.xlu1 %159  ;;  %v208_v3 = vpop.permute.xlu2 %207 }
  0xb0   :  { %v384_v0 = vpop.eup %383 }
  0xb1   :  { %v163_v2 = vmul.f32 %v384_v0, %v160_v63  ;;  %v386_v4 = vpop.eup %385 }
  0xb2   :  { %v211_v6 = vmul.f32 %v386_v4, %v208_v3  ;;  %v216_v21 = vpop.permute.xlu0 %215 }
  0xb3   :  { %v165_v5 = vadd.f32 %v163_v2, %v141_v51  ;;  %v222_v23 = vsub.f32 %v608_v24, %v216_v21 }
  0xb8   :  { %v172_v7 = vpop.permute.xlu1 %171  ;;  %v228_v9 = vpop.permute.xlu2 %227 }
  0xb9   :  { %v175_v8 = vsub.f32 %v615_v30, %v172_v7 }
  0xbb   :  { %387 = vtanh.f32 %v175_v8  ;;  %v244_v48 = vpop.permute.xlu0 %243 }
  0xbc   :  { %389 = vtanh.f32 %v174_v19  ;;  %v247_v54 = vsub.f32 %v615_v30, %v244_v48 }
  0xc1   :  { %v388_v10 = vpop.eup %387  ;;  %v192_v12 = vpop.permute.xlu1 %191 }
  0xc2   :  { %v187_v13 = vmul.f32 %v388_v10, %v184_v11  ;;  %v240_v14 = vpop.permute.xlu2 %239  ;;  %v198_v20 = vsub.f32 %v608_v24, %v192_v12  ;;  %v390_v27 = vpop.eup %389 }
  0xc3   :  { %v246_v26 = vsub.f32 %v608_v24, %v240_v14  ;;  %v186_v31 = vmul.f32 %v390_v27, %v180_v50 }
  0xc4   :  { %v189_v15 = vadd.f32 %v187_v13, %v165_v5  ;;  %391 = vtanh.f32 %v198_v20  ;;  %v292_v55 = vpop.permute.xlu0 %291 }
  0xc5   :  { %393 = vtanh.f32 %v222_v23  ;;  %v188_v36 = vadd.f32 %v186_v31, %v164_v1  ;;  %v295_v56 = vsub.f32 %v615_v30, %v292_v55 }
  0xc6   :  { %v213_v16 = vadd.f32 %v211_v6, %v189_v15  ;;  %395 = vtanh.f32 %v246_v26 }
  0xc9   :  { %v204_v17 = vpop.permute.xlu1 %203 }
  0xca   :  { %v264_v18 = vpop.permute.xlu2 %263  ;;  %v392_v29 = vpop.eup %391 }
  0xcb   :  { %v270_v28 = vsub.f32 %v608_v24, %v264_v18  ;;  %v210_v34 = vmul.f32 %v392_v29, %v204_v17  ;;  %v394_v35 = vpop.eup %393 }
  0xcc   :  { %v396_v38 = vpop.eup %395  ;;  %v234_v40 = vmul.f32 %v394_v35, %v228_v9  ;;  %v304_v2 = vpop.permute.xlu0 %303 }
  0xcd   :  { %397 = vtanh.f32 %v270_v28  ;;  %v212_v39 = vadd.f32 %v210_v34, %v188_v36 }
  0xcf   :  { %v236_v44 = vadd.f32 %v234_v40, %v212_v39 }
  0xd2   :  { %v220_v22 = vpop.permute.xlu1 %219 }
  0xd3   :  { %v288_v25 = vpop.permute.xlu2 %287  ;;  %v398_v41 = vpop.eup %397  ;;  %v223_v52 = vsub.f32 %v615_v30, %v220_v22 }
  0xd4   :  { %v294_v33 = vsub.f32 %v608_v24, %v288_v25 }
  0xd6   :  { %399 = vtanh.f32 %v294_v33 }
  0xd7   :  { %401 = vtanh.f32 %v223_v52 }
  0xd8   :  { %403 = vtanh.f32 %v247_v54 }
  0xd9   :  { %405 = vtanh.f32 %v295_v56 }
  0xda   :  { %v232_v32 = vpop.permute.xlu1 %231 }
  0xdc   :  { %v276_v37 = vpop.permute.xlu2 %275  ;;  %v400_v46 = vpop.eup %399 }
  0xdd   :  { %v282_v43 = vmul.f32 %v398_v41, %v276_v37  ;;  %v402_v59 = vpop.eup %401 }
  0xde   :  { %v404_v60 = vpop.eup %403  ;;  %v235_v61 = vmul.f32 %v402_v59, %v232_v32 }
  0xdf   :  { %v406_v63 = vpop.eup %405 }
  0xe0   :  { %v237_v0 = vadd.f32 %v235_v61, %v213_v16 }
  0xe3   :  { %v252_v42 = vpop.permute.xlu1 %251 }
  0xe4   :  { %v258_v45 = vmul.f32 %v396_v38, %v252_v42 }
  0xe5   :  { %v300_v49 = vpop.permute.xlu2 %299 }
  0xe6   :  { %v260_v47 = vadd.f32 %v258_v45, %v236_v44  ;;  %v306_v51 = vmul.f32 %v400_v46, %v300_v49 }
  0xe8   :  { %v284_v50 = vadd.f32 %v282_v43, %v260_v47 }
  0xea   :  { %v308_v24 = vadd.f32 %v306_v51, %v284_v50 }
  0xec   :  { %310 = vst [vmem:[#allocation9] sm:$0xff] %v308_v24  ;;  %v268_v53 = vpop.permute.xlu1 %267 }
  0xed   :  { %v271_v57 = vsub.f32 %v615_v30, %v268_v53  ;;  %v307_v30 = vmul.f32 %v406_v63, %v304_v2 }
  0xef   :  { %407 = vtanh.f32 %v271_v57 }
  0xf5   :  { %v256_v58 = vpop.permute.xlu1 %255  ;;  %v408_v1 = vpop.eup %407 }
  0xf6   :  { %v259_v62 = vmul.f32 %v404_v60, %v256_v58 }
  0xf8   :  { %v261_v4 = vadd.f32 %v259_v62, %v237_v0 }
  0xfe   :  { %v280_v3 = vpop.permute.xlu1 %279 }
  0xff   :  { %v283_v5 = vmul.f32 %v408_v1, %v280_v3 }
 0x101   :  { %v285_v6 = vadd.f32 %v283_v5, %v261_v4 }
 0x103   :  { %v309_v7 = vadd.f32 %v307_v30, %v285_v6 }
 0x105   :  { %311 = vst [vmem:[#allocation9 + $0x8] sm:$0xff] %v309_v7 }
 0x106   :  { %324 = dma.vmem_to_hbm [thread:$0]  %s317_s6, 256, %s319_s9, [#allocation5], %s512_s23, %s512_s23, %s513_s24  }
 0x107   :  { %509 = dma.done.wait [#allocation5], 256  }
 0x108   :  { %510 = vsyncadd [#allocation5], 4294967040 }
 0x109   :  { %329 = vsyncpa [#allocation4], 1 }
 0x10a   :  { %330 = vsyncpa [#allocation7], 1 }
 0x10b   :  { %331 = vsyncpa [#allocation5], 1 }

</bundles_post_ra>
